<compile_context>
chip_gen: v7x
topology: tpu7x:2x2x1
jax: 0.10.0
libtpu: 0.0.40
codegen_flags: <defaults>
</compile_context>

<pallas_src>
import functools

import jax
import jax.numpy as jnp
from jax import lax
from jax.experimental import pallas as pl
from jax.experimental.pallas import tpu as pltpu

MARGIN = 0.3


def _triplet_kernel(xi_ref, xj_ref, sqc_ref, sqr_ref, tc_ref, tr_ref,
                    loss_ref, corr_ref, ap_ref, an_ref,
                    *, n_valid, tm, tn, margin, inv_n):
    i = pl.program_id(0)
    j = pl.program_id(1)
    nj = pl.num_programs(1)

    # Zero the scalar accumulators once, at the very first grid step.
    @pl.when(jnp.logical_and(i == 0, j == 0))
    def _():
        loss_ref[0, 0] = jnp.float32(0.0)
        corr_ref[0, 0] = jnp.int32(0)

    # Reset per-row running max/min (over squared distances) at the start of each
    # row block's column sweep.
    @pl.when(j == 0)
    def _():
        ap_ref[...] = jnp.full(ap_ref.shape, -jnp.inf, dtype=jnp.float32)
        an_ref[...] = jnp.full(an_ref.shape, jnp.inf, dtype=jnp.float32)

    xi = xi_ref[...]  # (tm, Dp) f32
    xj = xj_ref[...]  # (tn, Dp) f32

    # Gram tile on the MXU: contract the feature dim of both operands (no transpose).
    gram = lax.dot_general(xi, xj, (((1,), (1,)), ((), ())),
                           preferred_element_type=jnp.float32)        # (tm, tn)
    # Squared pairwise distances; no sqrt here (mining is monotone in dist2).
    dist2 = sqc_ref[...] + sqr_ref[...] - 2.0 * gram                   # (tm, tn)

    same = tc_ref[...] == tr_ref[...]                                  # (tm, tn)
    col_ids = lax.broadcasted_iota(jnp.int32, (1, tn), 1) + j * tn
    col_valid = col_ids < n_valid                                      # (1, tn)
    pos_mask = jnp.logical_and(same, col_valid)
    neg_mask = jnp.logical_and(jnp.logical_not(same), col_valid)

    ap_ref[...] = jnp.maximum(
        ap_ref[...],
        jnp.max(jnp.where(pos_mask, dist2, -jnp.inf), axis=1, keepdims=True))
    an_ref[...] = jnp.minimum(
        an_ref[...],
        jnp.min(jnp.where(neg_mask, dist2, jnp.inf), axis=1, keepdims=True))

    # Finalize this row block after the last column block: sqrt only on the 2*tm
    # selected values, mask out padded rows, accumulate scalars into SMEM.
    @pl.when(j == nj - 1)
    def _():
        dist_ap = jnp.sqrt(jnp.maximum(ap_ref[...], 1e-12))            # (tm, 1)
        dist_an = jnp.sqrt(jnp.maximum(an_ref[...], 1e-12))            # (tm, 1)
        row_ids = lax.broadcasted_iota(jnp.int32, (tm, 1), 0) + i * tm
        row_valid = row_ids < n_valid                                  # (tm, 1)
        per = jnp.maximum(dist_ap - dist_an + margin, 0.0)
        per = jnp.where(row_valid, per, 0.0)
        loss_ref[0, 0] = loss_ref[0, 0] + jnp.sum(per) * inv_n
        hit = jnp.logical_and(row_valid, dist_an >= dist_ap)
        corr_ref[0, 0] = corr_ref[0, 0] + jnp.sum(hit.astype(jnp.int32))


def ori_triplet_loss(inputs, targets, *, margin=MARGIN, block=128):
    """inputs: (N, D) float features; targets: (N,) int labels. Returns (loss, correct)."""
    n, d = inputs.shape
    n_pad = ((n + block - 1) // block) * block
    d_pad = ((d + 127) // 128) * 128
    tm = tn = block

    x = jnp.pad(inputs.astype(jnp.float32), ((0, n_pad - n), (0, d_pad - d)))
    t = jnp.pad(targets.astype(jnp.int32), (0, n_pad - n), constant_values=-1)
    sq = jnp.sum(x * x, axis=1, keepdims=True)       # (n_pad, 1) squared norms
    sq_row = sq.reshape(1, n_pad)
    t_col = t.reshape(n_pad, 1)
    t_row = t.reshape(1, n_pad)

    kernel = functools.partial(
        _triplet_kernel, n_valid=n, tm=tm, tn=tn,
        margin=float(margin), inv_n=1.0 / float(n))

    grid = (n_pad // tm, n_pad // tn)
    loss, correct = pl.pallas_call(
        kernel,
        out_shape=(
            jax.ShapeDtypeStruct((1, 1), jnp.float32),
            jax.ShapeDtypeStruct((1, 1), jnp.int32),
        ),
        grid=grid,
        in_specs=[
            pl.BlockSpec((tm, d_pad), lambda i, j: (i, 0)),   # row block of x
            pl.BlockSpec((tn, d_pad), lambda i, j: (j, 0)),   # col block of x
            pl.BlockSpec((tm, 1), lambda i, j: (i, 0)),       # ||x_i||^2 (col form)
            pl.BlockSpec((1, tn), lambda i, j: (0, j)),       # ||x_j||^2 (row form)
            pl.BlockSpec((tm, 1), lambda i, j: (i, 0)),       # labels (col form)
            pl.BlockSpec((1, tn), lambda i, j: (0, j)),       # labels (row form)
        ],
        out_specs=(
            pl.BlockSpec((1, 1), lambda i, j: (0, 0),
                         memory_space=pltpu.MemorySpace.SMEM),
            pl.BlockSpec((1, 1), lambda i, j: (0, 0),
                         memory_space=pltpu.MemorySpace.SMEM),
        ),
        scratch_shapes=[
            pltpu.VMEM((tm, 1), jnp.float32),   # running max dist2 over positives
            pltpu.VMEM((tm, 1), jnp.float32),   # running min dist2 over negatives
        ],
        compiler_params=pltpu.CompilerParams(
            # Both axes accumulate into the shared scalar outputs -> not parallel.
            dimension_semantics=("arbitrary", "arbitrary")),
    )(x, x, sq, sq_row, t_col, t_row)
    return loss[0, 0], correct[0, 0]


def _reference(inputs, targets):
    # Pure-JAX reference mirroring the PyTorch forward.
    inputs = inputs.astype(jnp.float32)
    sq = jnp.sum(inputs ** 2, axis=1, keepdims=True)
    dist2 = sq + sq.T - 2.0 * jnp.dot(inputs, inputs.T,
                                      precision=lax.Precision.HIGHEST)
    dist = jnp.sqrt(jnp.maximum(dist2, 1e-12))
    mask = targets[:, None] == targets[None, :]
    dist_ap = jnp.max(jnp.where(mask, dist, -jnp.inf), axis=1)
    dist_an = jnp.min(jnp.where(mask, jnp.inf, dist), axis=1)
    loss = jnp.mean(jnp.maximum(dist_ap - dist_an + MARGIN, 0.0))
    correct = jnp.sum((dist_an >= dist_ap).astype(jnp.int32))
    return loss, correct


if __name__ == "__main__":
    key = jax.random.PRNGKey(0)
    k1, k2 = jax.random.split(key)

    # Small case matching the module's (batch_size, feat_dim) layout.
    n1, d1 = 8, 32
    x1 = jax.random.normal(k1, (n1, d1), dtype=jnp.float32)
    t1 = jnp.array([0, 0, 1, 1, 2, 2, 3, 3], dtype=jnp.int32)
    loss1, corr1 = ori_triplet_loss(x1, t1)
    jax.block_until_ready((loss1, corr1))
    rl1, rc1 = _reference(x1, t1)
    assert jnp.allclose(loss1, rl1, atol=1e-4, rtol=1e-4), (loss1, rl1)
    assert int(corr1) == int(rc1), (corr1, rc1)

    # Non-multiple-of-block case exercising the tiled grid + padding masks.
    n2, d2 = 200, 96
    x2 = jax.random.normal(k2, (n2, d2), dtype=jnp.float32)
    t2 = (jnp.arange(n2, dtype=jnp.int32) // 4) % 13
    loss2, corr2 = ori_triplet_loss(x2, t2)
    jax.block_until_ready((loss2, corr2))
    rl2, rc2 = _reference(x2, t2)
    assert jnp.allclose(loss2, rl2, atol=1e-4, rtol=1e-4), (loss2, rl2)
    assert int(corr2) == int(rc2), (corr2, rc2)

    print("KERNEL_OK")
</pallas_src>

<mosaic_0001>
module attributes {stable_mosaic.version = 11 : i64} {
  func.func @_triplet_kernel(%arg0: i32, %arg1: i32, %arg2: memref<128x128xf32, #tpu.memory_space<vmem>>, %arg3: memref<128x128xf32, #tpu.memory_space<vmem>>, %arg4: memref<128x1xf32, #tpu.memory_space<vmem>>, %arg5: memref<1x128xf32, #tpu.memory_space<vmem>>, %arg6: memref<128x1xi32, #tpu.memory_space<vmem>>, %arg7: memref<1x128xi32, #tpu.memory_space<vmem>>, %arg8: memref<1x1xf32, #tpu.memory_space<smem>>, %arg9: memref<1x1xi32, #tpu.memory_space<smem>>, %arg10: memref<128x1xf32, #tpu.memory_space<vmem>>, %arg11: memref<128x1xf32, #tpu.memory_space<vmem>>) attributes {dimension_semantics = [#tpu.dimension_semantics<arbitrary>, #tpu.dimension_semantics<arbitrary>], iteration_bounds = array<i64: 1, 1>, scalar_prefetch = 0 : i64, scratch_operands = 2 : i64, tpu.core_type = #tpu.core_type<tc>, window_params = [{transform_indices = @transform_0, window_bounds = array<i64: 128, 128>}, {transform_indices = @transform_1, window_bounds = array<i64: 128, 128>}, {transform_indices = @transform_2, window_bounds = array<i64: 128, 1>}, {transform_indices = @transform_3, window_bounds = array<i64: 1, 128>}, {transform_indices = @transform_4, window_bounds = array<i64: 128, 1>}, {transform_indices = @transform_5, window_bounds = array<i64: 1, 128>}, {transform_indices = @transform_6, window_bounds = array<i64: 1, 1>}, {transform_indices = @transform_7, window_bounds = array<i64: 1, 1>}]} {
    %c0_i32 = arith.constant 0 : i32
    %0 = arith.cmpi eq, %arg0, %c0_i32 : i32
    %c0_i32_0 = arith.constant 0 : i32
    %1 = arith.cmpi eq, %arg1, %c0_i32_0 : i32
    %2 = arith.andi %0, %1 : i1
    %3 = arith.extui %2 : i1 to i32
    %c0_i32_1 = arith.constant 0 : i32
    %4 = arith.cmpi ne, %3, %c0_i32_1 : i32
    scf.if %4 {
      %cst_31 = arith.constant 0.000000e+00 : f32
      %c0_32 = arith.constant 0 : index
      %c0_33 = arith.constant 0 : index
      %52 = memref.load %arg8[%c0_32, %c0_33] : memref<1x1xf32, #tpu.memory_space<smem>>
      memref.store %cst_31, %arg8[%c0_32, %c0_33] : memref<1x1xf32, #tpu.memory_space<smem>>
      %c0_i32_34 = arith.constant 0 : i32
      %c0_35 = arith.constant 0 : index
      %c0_36 = arith.constant 0 : index
      %53 = memref.load %arg9[%c0_35, %c0_36] : memref<1x1xi32, #tpu.memory_space<smem>>
      memref.store %c0_i32_34, %arg9[%c0_35, %c0_36] : memref<1x1xi32, #tpu.memory_space<smem>>
    } else {
    }
    %c0_i32_2 = arith.constant 0 : i32
    %5 = arith.cmpi eq, %arg1, %c0_i32_2 : i32
    %6 = arith.extui %5 : i1 to i32
    %c0_i32_3 = arith.constant 0 : i32
    %7 = arith.cmpi ne, %6, %c0_i32_3 : i32
    scf.if %7 {
      %cst_31 = arith.constant 0xFF800000 : f32
      %52 = vector.broadcast %cst_31 : f32 to vector<128x1xf32>
      %c0_32 = arith.constant 0 : index
      %c0_33 = arith.constant 0 : index
      %53 = vector.load %arg10[%c0_32, %c0_33] : memref<128x1xf32, #tpu.memory_space<vmem>>, vector<128x1xf32>
      tpu.vector_store %arg10[%c0_32, %c0_33], %52 {strides = array<i32>} : memref<128x1xf32, #tpu.memory_space<vmem>>, vector<128x1xf32>,
      %cst_34 = arith.constant 0x7F800000 : f32
      %54 = vector.broadcast %cst_34 : f32 to vector<128x1xf32>
      %c0_35 = arith.constant 0 : index
      %c0_36 = arith.constant 0 : index
      %55 = vector.load %arg11[%c0_35, %c0_36] : memref<128x1xf32, #tpu.memory_space<vmem>>, vector<128x1xf32>
      tpu.vector_store %arg11[%c0_35, %c0_36], %54 {strides = array<i32>} : memref<128x1xf32, #tpu.memory_space<vmem>>, vector<128x1xf32>,
    } else {
    }
    %c0 = arith.constant 0 : index
    %c0_4 = arith.constant 0 : index
    %8 = vector.load %arg2[%c0, %c0_4] : memref<128x128xf32, #tpu.memory_space<vmem>>, vector<128x128xf32>
    %c0_5 = arith.constant 0 : index
    %c0_6 = arith.constant 0 : index
    %9 = vector.load %arg3[%c0_5, %c0_6] : memref<128x128xf32, #tpu.memory_space<vmem>>, vector<128x128xf32>
    %cst = arith.constant dense<0.000000e+00> : vector<128x128xf32>
    %10 = tpu.matmul %8, %9, %cst {dimension_numbers = #tpu.dot_dimension_numbers<[1], [1], [0], [0], [0, 0, 1, 0], [], []>} : vector<128x128xf32>, vector<128x128xf32>, vector<128x128xf32> -> vector<128x128xf32>
    %c0_7 = arith.constant 0 : index
    %c0_8 = arith.constant 0 : index
    %11 = vector.load %arg4[%c0_7, %c0_8] : memref<128x1xf32, #tpu.memory_space<vmem>>, vector<128x1xf32>
    %c0_9 = arith.constant 0 : index
    %c0_10 = arith.constant 0 : index
    %12 = vector.load %arg5[%c0_9, %c0_10] : memref<1x128xf32, #tpu.memory_space<vmem>>, vector<1x128xf32>
    %13 = vector.broadcast %11 : vector<128x1xf32> to vector<128x128xf32>
    %14 = vector.broadcast %12 : vector<1x128xf32> to vector<128x128xf32>
    %15 = arith.addf %13, %14 : vector<128x128xf32>
    %cst_11 = arith.constant 2.000000e+00 : f32
    %16 = vector.broadcast %cst_11 : f32 to vector<128x128xf32>
    %17 = arith.mulf %16, %10 : vector<128x128xf32>
    %18 = arith.subf %15, %17 : vector<128x128xf32>
    %c0_12 = arith.constant 0 : index
    %c0_13 = arith.constant 0 : index
    %19 = vector.load %arg6[%c0_12, %c0_13] : memref<128x1xi32, #tpu.memory_space<vmem>>, vector<128x1xi32>
    %c0_14 = arith.constant 0 : index
    %c0_15 = arith.constant 0 : index
    %20 = vector.load %arg7[%c0_14, %c0_15] : memref<1x128xi32, #tpu.memory_space<vmem>>, vector<1x128xi32>
    %21 = vector.broadcast %19 : vector<128x1xi32> to vector<128x128xi32>
    %22 = vector.broadcast %20 : vector<1x128xi32> to vector<128x128xi32>
    %23 = arith.cmpi eq, %21, %22 : vector<128x128xi32>
    %24 = tpu.iota {dimensions = array<i32: 1>} : vector<1x128xi32>
    %c128_i32 = arith.constant 128 : i32
    %25 = arith.muli %arg1, %c128_i32 : i32
    %26 = vector.broadcast %25 : i32 to vector<1x128xi32>
    %27 = arith.addi %24, %26 : vector<1x128xi32>
    %c8_i32 = arith.constant 8 : i32
    %28 = vector.broadcast %c8_i32 : i32 to vector<1x128xi32>
    %29 = arith.cmpi slt, %27, %28 : vector<1x128xi32>
    %30 = vector.broadcast %29 : vector<1x128xi1> to vector<128x128xi1>
    %31 = arith.andi %23, %30 : vector<128x128xi1>
    %cst_16 = arith.constant dense<true> : vector<128x128xi1>
    %32 = arith.xori %23, %cst_16 : vector<128x128xi1>
    %33 = vector.broadcast %29 : vector<1x128xi1> to vector<128x128xi1>
    %34 = arith.andi %32, %33 : vector<128x128xi1>
    %c0_17 = arith.constant 0 : index
    %c0_18 = arith.constant 0 : index
    %35 = vector.load %arg10[%c0_17, %c0_18] : memref<128x1xf32, #tpu.memory_space<vmem>>, vector<128x1xf32>
    %cst_19 = arith.constant 0xFF800000 : f32
    %36 = vector.broadcast %cst_19 : f32 to vector<128x128xf32>
    %37 = arith.select %31, %18, %36 : vector<128x128xi1>, vector<128x128xf32>
    %cst_20 = arith.constant dense<0xFF800000> : vector<128xf32>
    %38 = vector.multi_reduction <maximumf>, %37, %cst_20 [1] : vector<128x128xf32> to vector<128xf32>
    %39 = vector.shape_cast %38 : vector<128xf32> to vector<128x1xf32>
    %40 = arith.maximumf %35, %39 : vector<128x1xf32>
    %c0_21 = arith.constant 0 : index
    %c0_22 = arith.constant 0 : index
    %41 = vector.load %arg10[%c0_21, %c0_22] : memref<128x1xf32, #tpu.memory_space<vmem>>, vector<128x1xf32>
    tpu.vector_store %arg10[%c0_21, %c0_22], %40 {strides = array<i32>} : memref<128x1xf32, #tpu.memory_space<vmem>>, vector<128x1xf32>,
    %c0_23 = arith.constant 0 : index
    %c0_24 = arith.constant 0 : index
    %42 = vector.load %arg11[%c0_23, %c0_24] : memref<128x1xf32, #tpu.memory_space<vmem>>, vector<128x1xf32>
    %cst_25 = arith.constant 0x7F800000 : f32
    %43 = vector.broadcast %cst_25 : f32 to vector<128x128xf32>
    %44 = arith.select %34, %18, %43 : vector<128x128xi1>, vector<128x128xf32>
    %cst_26 = arith.constant dense<0x7F800000> : vector<128xf32>
    %45 = vector.multi_reduction <minimumf>, %44, %cst_26 [1] : vector<128x128xf32> to vector<128xf32>
    %46 = vector.shape_cast %45 : vector<128xf32> to vector<128x1xf32>
    %47 = arith.minimumf %42, %46 : vector<128x1xf32>
    %c0_27 = arith.constant 0 : index
    %c0_28 = arith.constant 0 : index
    %48 = vector.load %arg11[%c0_27, %c0_28] : memref<128x1xf32, #tpu.memory_space<vmem>>, vector<128x1xf32>
    tpu.vector_store %arg11[%c0_27, %c0_28], %47 {strides = array<i32>} : memref<128x1xf32, #tpu.memory_space<vmem>>, vector<128x1xf32>,
    %c0_i32_29 = arith.constant 0 : i32
    %49 = arith.cmpi eq, %arg1, %c0_i32_29 : i32
    %50 = arith.extui %49 : i1 to i32
    %c0_i32_30 = arith.constant 0 : i32
    %51 = arith.cmpi ne, %50, %c0_i32_30 : i32
    scf.if %51 {
      %c0_31 = arith.constant 0 : index
      %c0_32 = arith.constant 0 : index
      %52 = vector.load %arg10[%c0_31, %c0_32] : memref<128x1xf32, #tpu.memory_space<vmem>>, vector<128x1xf32>
      %cst_33 = arith.constant 9.99999996E-13 : f32
      %53 = vector.broadcast %cst_33 : f32 to vector<128x1xf32>
      %54 = arith.maximumf %52, %53 : vector<128x1xf32>
      %55 = math.sqrt %54 : vector<128x1xf32>
      %c0_34 = arith.constant 0 : index
      %c0_35 = arith.constant 0 : index
      %56 = vector.load %arg11[%c0_34, %c0_35] : memref<128x1xf32, #tpu.memory_space<vmem>>, vector<128x1xf32>
      %cst_36 = arith.constant 9.99999996E-13 : f32
      %57 = vector.broadcast %cst_36 : f32 to vector<128x1xf32>
      %58 = arith.maximumf %56, %57 : vector<128x1xf32>
      %59 = math.sqrt %58 : vector<128x1xf32>
      %60 = tpu.iota {dimensions = array<i32: 0>} : vector<128x1xi32>
      %c128_i32_37 = arith.constant 128 : i32
      %61 = arith.muli %arg0, %c128_i32_37 : i32
      %62 = vector.broadcast %61 : i32 to vector<128x1xi32>
      %63 = arith.addi %60, %62 : vector<128x1xi32>
      %c8_i32_38 = arith.constant 8 : i32
      %64 = vector.broadcast %c8_i32_38 : i32 to vector<128x1xi32>
      %65 = arith.cmpi slt, %63, %64 : vector<128x1xi32>
      %66 = arith.subf %55, %59 : vector<128x1xf32>
      %cst_39 = arith.constant 3.000000e-01 : f32
      %67 = vector.broadcast %cst_39 : f32 to vector<128x1xf32>
      %68 = arith.addf %66, %67 : vector<128x1xf32>
      %cst_40 = arith.constant 0.000000e+00 : f32
      %69 = vector.broadcast %cst_40 : f32 to vector<128x1xf32>
      %70 = arith.maximumf %68, %69 : vector<128x1xf32>
      %cst_41 = arith.constant 0.000000e+00 : f32
      %71 = vector.broadcast %cst_41 : f32 to vector<128x1xf32>
      %72 = arith.select %65, %70, %71 : vector<128x1xi1>, vector<128x1xf32>
      %c0_42 = arith.constant 0 : index
      %c0_43 = arith.constant 0 : index
      %73 = memref.load %arg8[%c0_42, %c0_43] : memref<1x1xf32, #tpu.memory_space<smem>>
      %74 = vector.shape_cast %72 : vector<128x1xf32> to vector<1x128x1xf32>
      %cst_44 = arith.constant dense<0.000000e+00> : vector<1xf32>
      %75 = vector.multi_reduction <add>, %74, %cst_44 [1, 2] : vector<1x128x1xf32> to vector<1xf32>
      %76 = vector.shape_cast %75 : vector<1xf32> to vector<1x1x1xf32>
      %77 = vector.extract %76[0, 0, 0] : f32 from vector<1x1x1xf32>
      %cst_45 = arith.constant 1.250000e-01 : f32
      %78 = arith.mulf %77, %cst_45 : f32
      %79 = arith.addf %73, %78 : f32
      %c0_46 = arith.constant 0 : index
      %c0_47 = arith.constant 0 : index
      %80 = memref.load %arg8[%c0_46, %c0_47] : memref<1x1xf32, #tpu.memory_space<smem>>
      memref.store %79, %arg8[%c0_46, %c0_47] : memref<1x1xf32, #tpu.memory_space<smem>>
      %81 = arith.cmpf oge, %59, %55 : vector<128x1xf32>
      %82 = arith.andi %65, %81 : vector<128x1xi1>
      %c0_48 = arith.constant 0 : index
      %c0_49 = arith.constant 0 : index
      %83 = memref.load %arg9[%c0_48, %c0_49] : memref<1x1xi32, #tpu.memory_space<smem>>
      %84 = arith.extui %82 : vector<128x1xi1> to vector<128x1xi32>
      %85 = vector.shape_cast %84 : vector<128x1xi32> to vector<1x128x1xi32>
      %cst_50 = arith.constant dense<0> : vector<1xi32>
      %86 = vector.multi_reduction <add>, %85, %cst_50 [1, 2] : vector<1x128x1xi32> to vector<1xi32>
      %87 = vector.shape_cast %86 : vector<1xi32> to vector<1x1x1xi32>
      %88 = vector.extract %87[0, 0, 0] : i32 from vector<1x1x1xi32>
      %89 = arith.addi %83, %88 : i32
      %c0_51 = arith.constant 0 : index
      %c0_52 = arith.constant 0 : index
      %90 = memref.load %arg9[%c0_51, %c0_52] : memref<1x1xi32, #tpu.memory_space<smem>>
      memref.store %89, %arg9[%c0_51, %c0_52] : memref<1x1xi32, #tpu.memory_space<smem>>
    } else {
    }
    return
  }
  func.func @transform_0(%arg0: i32, %arg1: i32) -> (i32, i32) {
    %c0_i32 = arith.constant 0 : i32
    %c0_i32_0 = arith.constant 0 : i32
    return %arg0, %c0_i32 : i32, i32
  }
  func.func @transform_1(%arg0: i32, %arg1: i32) -> (i32, i32) {
    %c0_i32 = arith.constant 0 : i32
    %c0_i32_0 = arith.constant 0 : i32
    return %arg1, %c0_i32 : i32, i32
  }
  func.func @transform_2(%arg0: i32, %arg1: i32) -> (i32, i32) {
    %c0_i32 = arith.constant 0 : i32
    %c0_i32_0 = arith.constant 0 : i32
    return %arg0, %c0_i32 : i32, i32
  }
  func.func @transform_3(%arg0: i32, %arg1: i32) -> (i32, i32) {
    %c0_i32 = arith.constant 0 : i32
    %c0_i32_0 = arith.constant 0 : i32
    return %c0_i32, %arg1 : i32, i32
  }
  func.func @transform_4(%arg0: i32, %arg1: i32) -> (i32, i32) {
    %c0_i32 = arith.constant 0 : i32
    %c0_i32_0 = arith.constant 0 : i32
    return %arg0, %c0_i32 : i32, i32
  }
  func.func @transform_5(%arg0: i32, %arg1: i32) -> (i32, i32) {
    %c0_i32 = arith.constant 0 : i32
    %c0_i32_0 = arith.constant 0 : i32
    return %c0_i32, %arg1 : i32, i32
  }
  func.func @transform_6(%arg0: i32, %arg1: i32) -> (i32, i32) {
    %c0_i32 = arith.constant 0 : i32
    %c0_i32_0 = arith.constant 0 : i32
    %c0_i32_1 = arith.constant 0 : i32
    return %c0_i32, %c0_i32_0 : i32, i32
  }
  func.func @transform_7(%arg0: i32, %arg1: i32) -> (i32, i32) {
    %c0_i32 = arith.constant 0 : i32
    %c0_i32_0 = arith.constant 0 : i32
    %c0_i32_1 = arith.constant 0 : i32
    return %c0_i32, %c0_i32_0 : i32, i32
  }
}

</mosaic_0001>

<bundles_post_ra>
// kernel: tpu_custom_call.1
= control target key start
LH: loop header
LB: loop body
LE: loop exit
PB: predicated region body
PF: predicated region fallthrough
CT: control target
= control target key end

     0   :  { %13 = vsyncpa [#allocation5], 0  ;;  %v1493_v5 = vmov 0   ;;  %s2227_s0 = inlined_call_operand.vmem [shape: f32[128,128], index: 0, kind: input, shape index: {}]   ;;  %s2228_s1 = inlined_call_operand.vmem [shape: f32[128,128], index: 1, kind: input, shape index: {}]   ;;  %s2229_s2 = inlined_call_operand.vmem [shape: f32[128,1], index: 2, kind: input, shape index: {}]   ;;  %s2230_s3 = inlined_call_operand.vmem [shape: f32[1,128], index: 3, kind: input, shape index: {}]   ;;  %s2231_s4 = inlined_call_operand.vmem [shape: s32[128,1], index: 4, kind: input, shape index: {}]   ;;  %s2232_s5 = inlined_call_operand.vmem [shape: s32[1,128], index: 5, kind: input, shape index: {}]   ;;  %s2233_s6 = inlined_call_operand.hbm [shape: f32[1,1], index: 6, kind: output, shape index: {0}]   ;;  %s2234_s7 = inlined_call_operand.hbm [shape: s32[1,1], index: 7, kind: output, shape index: {1}]  }
   0x1   :  { %v89_v0 = vld [vmem:[%s2228_s1] sm:$0xff]  ;;  %v90_v1 = vld [vmem:[%s2228_s1 + $0x8] sm:$0xff]  ;;  %v91_v2 = vld [vmem:[%s2228_s1 + $0x10] sm:$0xff]  ;;  %1463 = vset.pattern.permute.xlu0 %v1493_v5  ;;  %1464 = vset.pattern.permute.xlu1 %v1493_v5 }
   0x2   :  { %v1403_v3 = vpack.c.bf16 %v90_v1, %v89_v0  ;;  %v92_v4 = vld [vmem:[%s2228_s1 + $0x18] sm:$0xff]  ;;  %v73_v7 = vld [vmem:[%s2227_s0] sm:$0xff]  ;;  %v94_v10 = vld [vmem:[%s2228_s1 + $0x28] sm:$0xff] }
   0x3   :  { %v1407_v6 = vpack.c.bf16 %v92_v4, %v91_v2  ;;  %v81_v8 = vld [vmem:[%s2227_s0 + $0x40] sm:$0xff]  ;;  %1379 = vmatprep.mubr.f32.mxu0 %v73_v7  ;;  %v95_v14 = vld [vmem:[%s2228_s1 + $0x30] sm:$0xff]  ;;  %v96_v15 = vld [vmem:[%s2228_s1 + $0x38] sm:$0xff] }
   0x4   :  { %1404 = vmatprep.subr.bf16.mxu0 %v1403_v3  ;;  %1435 = vmatprep.subr.bf16.mxu1 %v1403_v3  ;;  %v93_v9 = vld [vmem:[%s2228_s1 + $0x20] sm:$0xff]  ;;  %v251_v16 = vld [vmem:[%s2229_s2 + $0x8] sm:$0xff]  ;;  %v1415_v17 = vpack.c.bf16 %v96_v15, %v95_v14 }
   0x5   :  { %1406 = vmatpush3.bf16.xpose.msra.mxu0 %v1403_v3  ;;  %1443 = vmatpush3.bf16.xpose.msra.mxu1 %v1403_v3  ;;  %v1411_v11 = vpack.c.bf16 %v94_v10, %v93_v9  ;;  %v250_v12 = vld [vmem:[%s2229_s2] sm:$0xff] }
   0x6   :  { %1408 = vmatprep.subr.bf16.mxu0 %v1407_v6  ;;  %1436 = vmatprep.subr.bf16.mxu1 %v1407_v6  ;;  %v401_v13 = vld [vmem:[%s2231_s4] sm:$0xff] }
   0x7   :  { %1391 = vmatprep.mubr.f32.mxu1 %v81_v8  ;;  %269 = vperm.xlu0 %1463, %v250_v12  }
   0xb   :  { %419 = vperm.xlu0 %1463, %v401_v13  }
   0xd   :  { %1410 = vmatpush3.bf16.xpose.msra.mxu0 %v1407_v6  ;;  %1444 = vmatpush3.bf16.xpose.msra.mxu1 %v1407_v6 }
   0xe   :  { %1412 = vmatprep.subr.bf16.mxu0 %v1411_v11  ;;  %1437 = vmatprep.subr.bf16.mxu1 %v1411_v11 }
   0xf   :  { %14 = vsyncpa [#allocation7], 0  ;;  %274 = vperm.xlu0 %1463, %v251_v16   ;;  %v253_v18 = vld [vmem:[%s2229_s2 + $0x18] sm:$0xff]  ;;  %v97_v19 = vld [vmem:[%s2228_s1 + $0x40] sm:$0xff]  ;;  %v486_v61 = vlaneseq  ;;  %vm1494_vm3 = vmmov 1   ;;  %vm2235_vm6 = vcmask 7168  }
  0x10   :  { %v98_v20 = vld [vmem:[%s2228_s1 + $0x48] sm:$0xff]  ;;  %v254_v21 = vld [vmem:[%s2229_s2 + $0x20] sm:$0xff]  ;;  %v99_v24 = vld [vmem:[%s2228_s1 + $0x50] sm:$0xff] }
  0x11   :  { %v1419_v22 = vpack.c.bf16 %v98_v20, %v97_v19  ;;  %v255_v23 = vld [vmem:[%s2229_s2 + $0x28] sm:$0xff]  ;;  %v100_v25 = vld [vmem:[%s2228_s1 + $0x58] sm:$0xff]  ;;  %v256_v26 = vld [vmem:[%s2229_s2 + $0x30] sm:$0xff]  ;;  %v1694_v62 = vand.u32 127, %v486_v61 }
  0x12   :  { %v1423_v27 = vpack.c.bf16 %v100_v25, %v99_v24  ;;  %v258_v28 = vld [vmem:[%s2229_s2 + $0x40] sm:$0xff]  ;;  %v102_v30 = vld [vmem:[%s2228_s1 + $0x68] sm:$0xff]  ;;  %v260_v31 = vld [vmem:[%s2229_s2 + $0x50] sm:$0xff]  ;;  %v1495_v24 = vmov -inf   ;;  %v1496_v25 = vmov inf  }
  0x13   :  { %284 = vperm.xlu0 %1463, %v253_v18   ;;  %v101_v29 = vld [vmem:[%s2228_s1 + $0x60] sm:$0xff]  ;;  %v103_v34 = vld [vmem:[%s2228_s1 + $0x70] sm:$0xff]  ;;  %v104_v35 = vld [vmem:[%s2228_s1 + $0x78] sm:$0xff]  ;;  %vm491_vm1 = vcmp.lt.s32.totalorder %v1694_v62, 8  ;;  %41 = vst.msk [vmem:[#allocation2] sm:$0xff] %vm2235_vm6, %v1495_v24 }
  0x14   :  { %v1427_v32 = vpack.c.bf16 %v102_v30, %v101_v29  ;;  %v262_v33 = vld [vmem:[%s2229_s2 + $0x60] sm:$0xff]  ;;  %v264_v36 = vld [vmem:[%s2229_s2 + $0x70] sm:$0xff]  ;;  %v1431_v37 = vpack.c.bf16 %v104_v35, %v103_v34  ;;  %v402_v38 = vld [vmem:[%s2231_s4 + $0x8] sm:$0xff]  ;;  %42 = vst.msk [vmem:[#allocation2 + $0x8] sm:$0xff] %vm2235_vm6, %v1495_v24 }
  0x15   :  { %1414 = vmatpush3.bf16.xpose.msra.mxu0 %v1411_v11  ;;  %1445 = vmatpush3.bf16.xpose.msra.mxu1 %v1411_v11  ;;  %v404_v39 = vld [vmem:[%s2231_s4 + $0x18] sm:$0xff]  ;;  %v406_v40 = vld [vmem:[%s2231_s4 + $0x28] sm:$0xff]  ;;  %v75_v44 = vld [vmem:[%s2227_s0 + $0x10] sm:$0xff]  ;;  %43 = vst.msk [vmem:[#allocation2 + $0x10] sm:$0xff] %vm2235_vm6, %v1495_v24 }
  0x16   :  { %1416 = vmatprep.subr.bf16.mxu0 %v1415_v17  ;;  %1438 = vmatprep.subr.bf16.mxu1 %v1415_v17  ;;  %v408_v41 = vld [vmem:[%s2231_s4 + $0x38] sm:$0xff]  ;;  %v74_v42 = vld [vmem:[%s2227_s0 + $0x8] sm:$0xff]  ;;  %v83_v45 = vld [vmem:[%s2227_s0 + $0x50] sm:$0xff]  ;;  %44 = vst.msk [vmem:[#allocation2 + $0x18] sm:$0xff] %vm2235_vm6, %v1495_v24 }
  0x17   :  { %289 = vperm.xlu0 %1463, %v254_v21   ;;  %v82_v43 = vld [vmem:[%s2227_s0 + $0x48] sm:$0xff]  ;;  %v76_v47 = vld [vmem:[%s2227_s0 + $0x18] sm:$0xff]  ;;  %v77_v49 = vld [vmem:[%s2227_s0 + $0x20] sm:$0xff]  ;;  %45 = vst.msk [vmem:[#allocation2 + $0x20] sm:$0xff] %vm2235_vm6, %v1495_v24 }
  0x18   :  { %v410_v46 = vld [vmem:[%s2231_s4 + $0x48] sm:$0xff]  ;;  %v84_v48 = vld [vmem:[%s2227_s0 + $0x58] sm:$0xff]  ;;  %v85_v50 = vld [vmem:[%s2227_s0 + $0x60] sm:$0xff]  ;;  %46 = vst.msk [vmem:[#allocation2 + $0x28] sm:$0xff] %vm2235_vm6, %v1495_v24 }
  0x19   :  { %v412_v51 = vld [vmem:[%s2231_s4 + $0x58] sm:$0xff]  ;;  %v78_v52 = vld [vmem:[%s2227_s0 + $0x28] sm:$0xff]  ;;  %v79_v54 = vld [vmem:[%s2227_s0 + $0x30] sm:$0xff]  ;;  %47 = vst.msk [vmem:[#allocation2 + $0x30] sm:$0xff] %vm2235_vm6, %v1495_v24 }
  0x1a   :  { %v86_v53 = vld [vmem:[%s2227_s0 + $0x68] sm:$0xff]  ;;  %v87_v55 = vld [vmem:[%s2227_s0 + $0x70] sm:$0xff]  ;;  %v80_v57 = vld [vmem:[%s2227_s0 + $0x38] sm:$0xff]  ;;  %48 = vst.msk [vmem:[#allocation2 + $0x38] sm:$0xff] %vm2235_vm6, %v1495_v24 }
  0x1b   :  { %294 = vperm.xlu0 %1463, %v255_v23   ;;  %v414_v56 = vld [vmem:[%s2231_s4 + $0x68] sm:$0xff]  ;;  %v88_v58 = vld [vmem:[%s2227_s0 + $0x78] sm:$0xff]  ;;  %v1699_v63 = vld [vmem:[%s2230_s3] ss:$0 sm:$0xff]  ;;  %49 = vst.msk [vmem:[#allocation2 + $0x40] sm:$0xff] %vm2235_vm6, %v1495_v24 }
  0x1c   :  { %v416_v59 = vld [vmem:[%s2231_s4 + $0x78] sm:$0xff]  ;;  %v1704_v0 = vld [vmem:[%s2232_s5] ss:$0 sm:$0xff]  ;;  %50 = vst.msk [vmem:[#allocation2 + $0x48] sm:$0xff] %vm2235_vm6, %v1495_v24  ;;  %51 = vst.msk [vmem:[#allocation2 + $0x50] sm:$0xff] %vm2235_vm6, %v1495_v24  ;;  %s1469_s5 = scalar_lea.hbm %s2233_s6, 16 }
  0x1d   :  { %1418 = vmatpush3.bf16.xpose.msra.mxu0 %v1415_v17  ;;  %1446 = vmatpush3.bf16.xpose.msra.mxu1 %v1415_v17  ;;  %52 = vst.msk [vmem:[#allocation2 + $0x58] sm:$0xff] %vm2235_vm6, %v1495_v24  ;;  %53 = vst.msk [vmem:[#allocation2 + $0x60] sm:$0xff] %vm2235_vm6, %v1495_v24  ;;  %v261_v29 = vld [vmem:[%s2229_s2 + $0x58] sm:$0xff]  ;;  %v263_v30 = vld [vmem:[%s2229_s2 + $0x68] sm:$0xff]  ;;  %p1470_p0 = scmp.ne.s32.totalorder %s2233_s6, %s1469_s5  ;;  %p1473_p1 = scmp.lt.u32.totalorder %s1469_s5, %s2233_s6 }
  0x1e   :  { %1420 = vmatprep.subr.bf16.mxu0 %v1419_v22  ;;  %1439 = vmatprep.subr.bf16.mxu1 %v1419_v22  ;;  %54 = vst.msk [vmem:[#allocation2 + $0x68] sm:$0xff] %vm2235_vm6, %v1495_v24  ;;  %55 = vst.msk [vmem:[#allocation2 + $0x70] sm:$0xff] %vm2235_vm6, %v1495_v24  ;;  %v407_v34 = vld [vmem:[%s2231_s4 + $0x30] sm:$0xff]  ;;  %v409_v35 = vld [vmem:[%s2231_s4 + $0x40] sm:$0xff] }
  0x1f   :  { %299 = vperm.xlu0 %1463, %v256_v26   ;;  %56 = vst.msk [vmem:[#allocation2 + $0x78] sm:$0xff] %vm2235_vm6, %v1495_v24  ;;  %57 = vst.msk [vmem:[#allocation3] sm:$0xff] %vm2235_vm6, %v1496_v25  ;;  %v252_v26 = vld [vmem:[%s2229_s2 + $0x10] sm:$0xff]  ;;  %p1475_p2 = pnand %p1473_p1, %p1470_p0 }
  0x20   :  { %58 = vst.msk [vmem:[#allocation3 + $0x8] sm:$0xff] %vm2235_vm6, %v1496_v25  ;;  %59 = vst.msk [vmem:[#allocation3 + $0x10] sm:$0xff] %vm2235_vm6, %v1496_v25 }
  0x21   :  { %60 = vst.msk [vmem:[#allocation3 + $0x18] sm:$0xff] %vm2235_vm6, %v1496_v25  ;;  %61 = vst.msk [vmem:[#allocation3 + $0x20] sm:$0xff] %vm2235_vm6, %v1496_v25 }
  0x22   :  { %62 = vst.msk [vmem:[#allocation3 + $0x28] sm:$0xff] %vm2235_vm6, %v1496_v25  ;;  %63 = vst.msk [vmem:[#allocation3 + $0x30] sm:$0xff] %vm2235_vm6, %v1496_v25 }
  0x23   :  { %309 = vperm.xlu0 %1463, %v258_v28   ;;  %64 = vst.msk [vmem:[#allocation3 + $0x38] sm:$0xff] %vm2235_vm6, %v1496_v25  ;;  %65 = vst.msk [vmem:[#allocation3 + $0x40] sm:$0xff] %vm2235_vm6, %v1496_v25  ;;  %v259_v28 = vld [vmem:[%s2229_s2 + $0x48] sm:$0xff] }
  0x24   :  { %66 = vst.msk [vmem:[#allocation3 + $0x48] sm:$0xff] %vm2235_vm6, %v1496_v25  ;;  %67 = vst.msk [vmem:[#allocation3 + $0x50] sm:$0xff] %vm2235_vm6, %v1496_v25 }
  0x25   :  { %1422 = vmatpush3.bf16.xpose.msra.mxu0 %v1419_v22  ;;  %1447 = vmatpush3.bf16.xpose.msra.mxu1 %v1419_v22  ;;  %68 = vst.msk [vmem:[#allocation3 + $0x58] sm:$0xff] %vm2235_vm6, %v1496_v25  ;;  %69 = vst.msk [vmem:[#allocation3 + $0x60] sm:$0xff] %vm2235_vm6, %v1496_v25 }
  0x26   :  { %1424 = vmatprep.subr.bf16.mxu0 %v1423_v27  ;;  %1440 = vmatprep.subr.bf16.mxu1 %v1423_v27  ;;  %70 = vst.msk [vmem:[#allocation3 + $0x68] sm:$0xff] %vm2235_vm6, %v1496_v25  ;;  %71 = vst.msk [vmem:[#allocation3 + $0x70] sm:$0xff] %vm2235_vm6, %v1496_v25 }
  0x27   :  { %319 = vperm.xlu0 %1463, %v260_v31   ;;  %72 = vst.msk [vmem:[#allocation3 + $0x78] sm:$0xff] %vm2235_vm6, %v1496_v25  ;;  %v265_v31 = vld [vmem:[%s2229_s2 + $0x78] sm:$0xff] }
  0x2b   :  { %329 = vperm.xlu0 %1463, %v262_v33   ;;  %v405_v33 = vld [vmem:[%s2231_s4 + $0x20] sm:$0xff] }
  0x2d   :  { %1426 = vmatpush3.bf16.xpose.msra.mxu0 %v1423_v27  ;;  %1448 = vmatpush3.bf16.xpose.msra.mxu1 %v1423_v27  ;;  %v257_v27 = vld [vmem:[%s2229_s2 + $0x38] sm:$0xff] }
  0x2e   :  { %1428 = vmatprep.subr.bf16.mxu0 %v1427_v32  ;;  %1441 = vmatprep.subr.bf16.mxu1 %v1427_v32 }
  0x2f   :  { %339 = vperm.xlu0 %1463, %v264_v36   ;;  %v411_v36 = vld [vmem:[%s2231_s4 + $0x50] sm:$0xff] }
  0x33   :  { %422 = vperm.xlu0 %1463, %v402_v38   ;;  %v415_v38 = vld [vmem:[%s2231_s4 + $0x70] sm:$0xff] }
  0x35   :  { %1430 = vmatpush3.bf16.xpose.msra.mxu0 %v1427_v32  ;;  %1449 = vmatpush3.bf16.xpose.msra.mxu1 %v1427_v32  ;;  %v403_v32 = vld [vmem:[%s2231_s4 + $0x10] sm:$0xff] }
  0x36   :  { %1432 = vmatprep.subr.bf16.mxu0 %v1431_v37  ;;  %1442 = vmatprep.subr.bf16.mxu1 %v1431_v37 }
  0x37   :  { %428 = vperm.xlu0 %1463, %v404_v39  }
  0x3b   :  { %434 = vperm.xlu0 %1463, %v406_v40  }
  0x3d   :  { %1434 = vmatpush3.bf16.xpose.msra.mxu0 %v1431_v37  ;;  %1450 = vmatpush3.bf16.xpose.msra.mxu1 %v1431_v37  ;;  %v413_v37 = vld [vmem:[%s2231_s4 + $0x60] sm:$0xff] }
  0x3f   :  { %440 = vperm.xlu0 %1463, %v408_v41  }
  0x43   :  { %446 = vperm.xlu0 %1463, %v410_v46  }
  0x44   :  { %1380 = vmatmul.mubr.f32.vlgmr.msra.gmra.mrb[0].mxu0 %v74_v42  ;;  %1392 = vmatmul.mubr.f32.vlgmr.msra.gmra.mrb[0].mxu1 %v82_v43 }
  0x45   :  { %1382 = vmatprep.mubr.f32.mxu0 %v75_v44  ;;  %1394 = vmatprep.mubr.f32.mxu1 %v83_v45  ;;  %v542_v45 = vld [vmem:[#allocation2] sm:$0xff] }
  0x47   :  { %452 = vperm.xlu0 %1463, %v412_v51  }
  0x48   :  { %1383 = vmatmul.mubr.f32.gmra.mrb[2].mxu0 %v76_v47  ;;  %1395 = vmatmul.mubr.f32.gmra.mrb[2].mxu1 %v84_v48  ;;  %v639_v48 = vld [vmem:[#allocation3] sm:$0xff] }
  0x49   :  { %1385 = vmatprep.mubr.f32.mxu0 %v77_v49  ;;  %1397 = vmatprep.mubr.f32.mxu1 %v85_v50 }
  0x4b   :  { %458 = vperm.xlu0 %1463, %v414_v56  }
  0x4c   :  { %1386 = vmatmul.mubr.f32.gmra.mrb[4].mxu0 %v78_v52  ;;  %1398 = vmatmul.mubr.f32.gmra.mrb[4].mxu1 %v86_v53 }
  0x4d   :  { %1388 = vmatprep.mubr.f32.mxu0 %v79_v54  ;;  %1400 = vmatprep.mubr.f32.mxu1 %v87_v55 }
  0x4f   :  { %464 = vperm.xlu0 %1463, %v416_v59  }
  0x50   :  { %1389 = vmatmul.mubr.f32.gmra.mrb[6].mxu0 %v80_v57  ;;  %1401 = vmatmul.mubr.f32.gmra.mrb[6].mxu1 %v88_v58 }
  0x86   :  { %v270_v60 = vpop.permute.xlu0 %269 }
  0x87   :  { %v353_v7 = vadd.f32 %v1699_v63, %v270_v60 }
  0x8a   :  { %v420_v1 = vpop.permute.xlu0 %419 }
  0x8b   :  { %vm470_vm0 = vcmp.eq.s32.totalorder %v420_v1, %v1704_v0 }
  0x8c   :  { %vm494_vm2 = vmand %vm470_vm0, %vm491_vm1 }
  0x8d   :  { %vm510_vm4 = vmxor %vm470_vm0, %vm1494_vm3 }
  0x8e   :  { %vm526_vm5 = vmand %vm510_vm4, %vm491_vm1  ;;  %v275_v39 = vpop.permute.xlu0 %274 }
  0x92   :  { %v285_v40 = vpop.permute.xlu0 %284 }
  0x96   :  { %v1815_v41 = vpop.permute.xlu0 %289 }
  0x9a   :  { %v1817_v42 = vpop.permute.xlu0 %294 }
  0x9e   :  { %v1819_v43 = vpop.permute.xlu0 %299 }
  0xa2   :  { %v1821_v44 = vpop.permute.xlu0 %309 }
  0xa6   :  { %v1823_v49 = vpop.permute.xlu0 %319 }
  0xaa   :  { %v1827_v53 = vpop.permute.xlu0 %329 }
  0xae   :  { %v1831_v58 = vpop.permute.xlu0 %339 }
  0xb2   :  { %v1837_v1 = vpop.permute.xlu0 %422 }
  0xb3   :  { %vm471_vm12 = vcmp.eq.s32.totalorder %v1837_v1, %v1704_v0 }
  0xb4   :  { %vm495_vm15 = vmand %vm471_vm12, %vm491_vm1 }
 0x117   :  { %v1706_v2 = vpop.f32.mrb[0].mxu0  ;;  %v1708_v3 = vpop.f32.mrb[0].mxu1 }
 0x118   :  { %v171_v4 = vpop.f32.mrb[1].mxu0  ;;  %v1710_v6 = vpop.f32.mrb[1].mxu1 }
 0x119   :  { %v369_v8 = vmul.f32 2.0, %v171_v4 }
 0x11b   :  { %v1715_v9 = vpop.f32.mrb[2].mxu0  ;;  %v1717_v10 = vpop.f32.mrb[2].mxu1  ;;  %v385_v11 = vsub.f32 %v353_v7, %v369_v8 }
 0x11c   :  { %v1719_v12 = vpop.f32.mrb[3].mxu1  ;;  %v1723_v13 = vpop.f32.mrb[3].mxu0 }
 0x11d   :  { %v558_v14 = vsel %vm494_vm2, %v385_v11, -inf  ;;  %v655_v19 = vsel %vm526_vm5, %v385_v11, inf }
 0x11e   :  { %574 = vmax.xlane.f32.xlu1 %v558_v14  ;;  %v1841_v14 = vpop.permute.xlu0 %428 }
 0x11f   :  { %v1726_v15 = vpop.f32.mrb[4].mxu0  ;;  %v1728_v16 = vpop.f32.mrb[4].mxu1  ;;  %vm473_vm14 = vcmp.eq.s32.totalorder %v1841_v14, %v1704_v0 }
 0x120   :  { %v1730_v17 = vpop.f32.mrb[5].mxu0  ;;  %v1732_v18 = vpop.f32.mrb[5].mxu1  ;;  %vm497_vm4 = vmand %vm473_vm14, %vm491_vm1 }
 0x122   :  { %671 = vmin.xlane.f32.xlu1 %v655_v19 }
 0x123   :  { %v1736_v20 = vpop.f32.mrb[6].mxu0  ;;  %v1738_v21 = vpop.f32.mrb[6].mxu1 }
 0x124   :  { %v1740_v22 = vpop.f32.mrb[7].mxu0  ;;  %v1742_v23 = vpop.f32.mrb[7].mxu1 }
 0x133   :  { %279 = vperm.xlu1 %1464, %v252_v26  }
 0x137   :  { %304 = vperm.xlu1 %1464, %v257_v27  }
 0x13b   :  { %314 = vperm.xlu1 %1464, %v259_v28  }
 0x13f   :  { %324 = vperm.xlu1 %1464, %v261_v29  }
 0x143   :  { %334 = vperm.xlu1 %1464, %v263_v30  }
 0x147   :  { %344 = vperm.xlu1 %1464, %v265_v31  }
 0x14b   :  { %425 = vperm.xlu1 %1464, %v403_v32  }
 0x14f   :  { %431 = vperm.xlu1 %1464, %v405_v33   ;;  %v1847_v33 = vpop.permute.xlu0 %434 }
 0x150   :  { %vm475_vm5 = vcmp.eq.s32.totalorder %v1847_v33, %v1704_v0 }
 0x153   :  { %437 = vperm.xlu1 %1464, %v407_v34  }
 0x157   :  { %443 = vperm.xlu1 %1464, %v409_v35   ;;  %v354_v35 = vadd.f32 %v1699_v63, %v275_v39  ;;  %v356_v39 = vadd.f32 %v1699_v63, %v285_v40 }
 0x15b   :  { %449 = vperm.xlu1 %1464, %v411_v36   ;;  %v370_v36 = vmul.f32 2.0, %v1706_v2  ;;  %v1861_v2 = vpop.permute.xlu0 %440 }
 0x15f   :  { %455 = vperm.xlu1 %1464, %v413_v37  }
 0x163   :  { %461 = vperm.xlu1 %1464, %v415_v38  }
 0x1ab   :  { %v575_v46 = vpop.xlane.xlu1 %574 }
 0x1ac   :  { %v606_v47 = vmax.f32 %v542_v45, %v575_v46 }
 0x1ae   :  { %623 = vst.msk [vmem:[#allocation2] sm:$0xff] %vm2235_vm6, %v606_v47 }
 0x1af   :  { %v672_v50 = vpop.xlane.xlu1 %671 }
 0x1b0   :  { %v703_v51 = vmin.f32 %v639_v48, %v672_v50  ;;  %v372_v48 = vmul.f32 2.0, %v1715_v9 }
 0x1b2   :  { %719 = vst.msk [vmem:[#allocation3] sm:$0xff] %vm2235_vm6, %v703_v51  ;;  %v1876_v40 = vsub.f32 %v356_v39, %v372_v48 }
 0x1b3   :  { %v280_v52 = vpop.permute.xlu1 %279 }
 0x1b5   :  { %v738_v54 = vld [vmem:[#allocation2] sm:$0xff] }
 0x1b6   :  { %v754_v55 = vmax.f32 %v738_v54, 1e-12  ;;  %v1858_v54 = vsub.f32 %v354_v35, %v370_v36 }
 0x1b7   :  { %v1829_v56 = vpop.permute.xlu1 %304 }
 0x1b8   :  { %1465 = vrsqrt.f32 %v754_v55  ;;  %vm772_vm7 = vcmp.eq.f32.partialorder %v754_v55, inf  ;;  %v775_v26 = vand.u32 2147483648, %v754_v55  ;;  %vm774_vm9 = vcmp.eq.f32.partialorder %v754_v55, 0.0 }
 0x1b9   :  { %v882_v57 = vld [vmem:[#allocation3] sm:$0xff] }
 0x1ba   :  { %v898_v59 = vmax.f32 %v882_v57, 1e-12  ;;  %v355_v57 = vadd.f32 %v1699_v63, %v280_v52  ;;  %v559_v52 = vsel %vm495_vm15, %v1858_v54, -inf }
 0x1bb   :  { %v1833_v60 = vpop.permute.xlu1 %314 }
 0x1bc   :  { %1467 = vrsqrt.f32 %v898_v59  ;;  %vm916_vm8 = vcmp.eq.f32.partialorder %v898_v59, inf  ;;  %v919_v27 = vand.u32 2147483648, %v898_v59  ;;  %vm918_vm10 = vcmp.eq.f32.partialorder %v898_v59, 0.0 }
 0x1bf   :  { %v1835_v61 = vpop.permute.xlu1 %324 }
 0x1c2   :  { %v1466_v4 = vpop.eup %1465 }
 0x1c3   :  { %v1839_v7 = vpop.permute.xlu1 %334  ;;  %v771_v8 = vmul.f32 %v1466_v4, %v754_v55 }
 0x1c5   :  { %v773_v24 = vsel %vm772_vm7, %v754_v55, %v771_v8  ;;  %v371_v55 = vmul.f32 2.0, %v1723_v13  ;;  %v374_v13 = vmul.f32 2.0, %v1726_v15  ;;  %v358_v8 = vadd.f32 %v1699_v63, %v1817_v42 }
 0x1c6   :  { %v1468_v11 = vpop.eup %1467  ;;  %v776_v29 = vsel %vm774_vm9, %v775_v26, %v773_v24  ;;  %v373_v15 = vmul.f32 2.0, %v1730_v17  ;;  %v1908_v17 = vpop.permute.xlu0 %446  ;;  %v561_v42 = vsel %vm497_vm4, %v1876_v40, -inf  ;;  %v376_v26 = vmul.f32 2.0, %v1736_v20 }
 0x1c7   :  { %v1843_v19 = vpop.permute.xlu1 %344  ;;  %v915_v25 = vmul.f32 %v1468_v11, %v898_v59  ;;  %v1902_v24 = vsub.f32 %v355_v57, %v371_v55  ;;  %vm477_vm9 = vcmp.eq.s32.totalorder %v1861_v2, %v1704_v0  ;;  %v365_v57 = vadd.f32 %v1699_v63, %v1827_v53 }
 0x1c8   :  { %vm501_vm4 = vmand %vm477_vm9, %vm491_vm1 }
 0x1c9   :  { %v917_v28 = vsel %vm916_vm8, %v898_v59, %v915_v25  ;;  %v357_v25 = vadd.f32 %v1699_v63, %v1815_v41  ;;  %v375_v41 = vmul.f32 2.0, %v1740_v22  ;;  %v362_v22 = vadd.f32 %v1699_v63, %v1833_v60 }
 0x1ca   :  { %v920_v30 = vsel %vm918_vm10, %v919_v27, %v917_v28  ;;  %v360_v27 = vadd.f32 %v1699_v63, %v1829_v56  ;;  %v359_v56 = vadd.f32 %v1699_v63, %v1819_v43  ;;  %vm499_vm10 = vmand %vm475_vm5, %vm491_vm1  ;;  %v1947_v36 = vpop.permute.xlu0 %452  ;;  %v361_v60 = vadd.f32 %v1699_v63, %v1821_v44 }
 0x1cb   :  { %v1845_v31 = vpop.permute.xlu1 %425  ;;  %vm1186_vm11 = vcmp.ge.f32.partialorder %v920_v30, %v776_v29  ;;  %v1077_v32 = vsub.f32 %v776_v29, %v920_v30  ;;  %v1917_v29 = vsub.f32 %v358_v8, %v374_v13  ;;  %v1927_v20 = vsub.f32 %v357_v25, %v373_v15 }
 0x1cc   :  { %v1219_v34 = vsel %vm1186_vm11, 1, %v1493_v5  ;;  %vm472_vm13 = vcmp.eq.s32.totalorder %v1845_v31, %v1704_v0  ;;  %v378_v30 = vmul.f32 2.0, %v1708_v3  ;;  %v1945_v35 = vsub.f32 %v360_v27, %v376_v26 }
 0x1cd   :  { %v1235_v37 = vsel %vm2235_vm6, %v1219_v34, 0  ;;  %v1093_v38 = vadd.f32 0.3, %v1077_v32  ;;  %vm1886_vm0 = vmand %vm472_vm13, %vm491_vm1  ;;  %v563_v34 = vsel %vm499_vm10, %v1917_v29, -inf  ;;  %v377_v3 = vmul.f32 2.0, %v1710_v6 }
 0x1ce   :  { %v1267_v45 = vshrl.u32 %v1235_v37, 16  ;;  %v1266_v46 = vand.u32 65535, %v1235_v37  ;;  %v560_v28 = vsel %vm1886_vm0, %v1902_v24, -inf  ;;  %v1955_v37 = vsub.f32 %v359_v56, %v375_v41 }
 0x1cf   :  { %v1853_v47 = vpop.permute.xlu1 %431  ;;  %v1109_v5 = vmax.f32 %v1093_v38, 0.0  ;;  %vm2236_vm0 = vcmp.eq.s32.totalorder %v1908_v17, %v1704_v0  ;;  %v380_v38 = vmul.f32 2.0, %v1717_v10  ;;  %v364_v6 = vadd.f32 %v1699_v63, %v1835_v61 }
 0x1d0   :  { %v1269_v50 = vcvt.s32.f32 %v1267_v45  ;;  %v1268_v51 = vcvt.s32.f32 %v1266_v46  ;;  %vm474_vm2 = vcmp.eq.s32.totalorder %v1853_v47, %v1704_v0  ;;  %v565_v45 = vsel %vm501_vm4, %v1945_v35, -inf  ;;  %vm503_vm4 = vmand %vm2236_vm0, %vm491_vm1 }
 0x1d1   :  { %v1142_v59 = vsel %vm2235_vm6, %v1109_v5, 0.0  ;;  %vm498_vm7 = vmand %vm474_vm2, %vm491_vm1  ;;  %v1973_v48 = vsub.f32 %v362_v22, %v378_v30  ;;  %v379_v10 = vmul.f32 2.0, %v1719_v12  ;;  %v1985_v61 = vsub.f32 %v361_v60, %v377_v3  ;;  %v543_v30 = vld [vmem:[#allocation2 + $0x8] sm:$0xff]  ;;  %v545_v3 = vld [vmem:[#allocation2 + $0x18] sm:$0xff] }
 0x1d2   :  { %1272 = vadd.xlane.f32.xlu1 %v1269_v50  ;;  %1270 = vadd.xlane.f32.xlu0 %v1268_v51  ;;  %v562_v43 = vsel %vm498_vm7, %v1927_v20, -inf  ;;  %v363_v50 = vadd.f32 %v1699_v63, %v1823_v49  ;;  %v1991_v51 = vpop.permute.xlu0 %458  ;;  %v382_v5 = vmul.f32 2.0, %v1728_v16  ;;  %v366_v12 = vadd.f32 %v1699_v63, %v1839_v7 }
 0x1d3   :  { %v1867_v9 = vpop.permute.xlu1 %437  ;;  %v567_v39 = vsel %vm503_vm4, %v1973_v48, -inf  ;;  %v2003_v55 = vsub.f32 %v364_v6, %v380_v38  ;;  %v381_v16 = vmul.f32 2.0, %v1732_v18  ;;  %v384_v13 = vmul.f32 2.0, %v1738_v21 }
 0x1d4   :  { %vm476_vm8 = vcmp.eq.s32.totalorder %v1867_v9, %v1704_v0  ;;  %v2013_v7 = vsub.f32 %v363_v50, %v379_v10  ;;  %v368_v18 = vadd.f32 %v1699_v63, %v1843_v19  ;;  %v2031_v4 = vsub.f32 %v366_v12, %v382_v5  ;;  %v547_v10 = vld [vmem:[#allocation2 + $0x28] sm:$0xff] }
 0x1d5   :  { %vm500_vm11 = vmand %vm476_vm8, %vm491_vm1  ;;  %v383_v21 = vmul.f32 2.0, %v1742_v23  ;;  %v2043_v19 = vsub.f32 %v365_v57, %v381_v16  ;;  %v367_v15 = vadd.f32 %v1699_v63, %v1831_v58  ;;  %v548_v57 = vld [vmem:[#allocation2 + $0x30] sm:$0xff] }
 0x1d6   :  { %576 = vmax.xlane.f32.xlu1 %v559_v52  ;;  %1173 = vadd.xlane.f32.xlu0 %v1142_v59  ;;  %v564_v46 = vsel %vm500_vm11, %v1955_v37, -inf  ;;  %vm2238_vm11 = vcmp.eq.s32.totalorder %v1947_v36, %v1704_v0  ;;  %v2033_v8 = vpop.permute.xlu0 %464 }
 0x1d7   :  { %v1895_v11 = vpop.permute.xlu1 %443  ;;  %vm505_vm4 = vmand %vm2238_vm11, %vm491_vm1  ;;  %v399_v63 = vsub.f32 %v367_v15, %v383_v21  ;;  %v551_v21 = vld [vmem:[#allocation2 + $0x48] sm:$0xff] }
 0x1d8   :  { %vm478_vm15 = vcmp.eq.s32.totalorder %v1895_v11, %v1704_v0  ;;  %v569_v59 = vsel %vm505_vm4, %v2003_v55, -inf  ;;  %vm2242_vm4 = vcmp.eq.s32.totalorder %v2033_v8, %v1704_v0 }
 0x1d9   :  { %vm502_vm7 = vmand %vm478_vm15, %vm491_vm1 }
 0x1da   :  { %580 = vmax.xlane.f32.xlu1 %v561_v42  ;;  %578 = vmax.xlane.f32.xlu0 %v560_v28  ;;  %v566_v49 = vsel %vm502_vm7, %v1985_v61, -inf  ;;  %vm2240_vm7 = vcmp.eq.s32.totalorder %v1991_v51, %v1704_v0  ;;  %v2056_v42 = vsub.f32 %v368_v18, %v384_v13 }
 0x1db   :  { %v1934_v32 = vpop.permute.xlu1 %449 }
 0x1dc   :  { %vm2237_vm10 = vcmp.eq.s32.totalorder %v1934_v32, %v1704_v0 }
 0x1dd   :  { %vm504_vm6 = vmand %vm2237_vm10, %vm491_vm1 }
 0x1de   :  { %584 = vmax.xlane.f32.xlu1 %v563_v34  ;;  %582 = vmax.xlane.f32.xlu0 %v562_v43  ;;  %v568_v53 = vsel %vm504_vm6, %v2013_v7, -inf  ;;  %vm507_vm6 = vmand %vm2240_vm7, %vm491_vm1 }
 0x1df   :  { %v1975_v44 = vpop.permute.xlu1 %455  ;;  %v571_v25 = vsel %vm507_vm6, %v2031_v4, -inf  ;;  %vm512_vm7 = vmxor %vm472_vm13, %vm1494_vm3 }
 0x1e0   :  { %vm2239_vm0 = vcmp.eq.s32.totalorder %v1975_v44, %v1704_v0  ;;  %vm511_vm6 = vmxor %vm471_vm12, %vm1494_vm3 }
 0x1e1   :  { %vm506_vm10 = vmand %vm2239_vm0, %vm491_vm1 }
 0x1e2   :  { %588 = vmax.xlane.f32.xlu1 %v565_v45  ;;  %586 = vmax.xlane.f32.xlu0 %v564_v46  ;;  %v570_v23 = vsel %vm506_vm10, %v2043_v19, -inf  ;;  %vm509_vm10 = vmand %vm2242_vm4, %vm491_vm1 }
 0x1e3   :  { %v2020_v52 = vpop.permute.xlu1 %461  ;;  %v573_v58 = vsel %vm509_vm10, %v2056_v42, -inf  ;;  %vm514_vm13 = vmxor %vm474_vm2, %vm1494_vm3 }
 0x1e4   :  { %vm2241_vm11 = vcmp.eq.s32.totalorder %v2020_v52, %v1704_v0  ;;  %vm527_vm4 = vmand %vm511_vm6, %vm491_vm1 }
 0x1e5   :  { %vm508_vm0 = vmand %vm2241_vm11, %vm491_vm1  ;;  %v656_v31 = vsel %vm527_vm4, %v1858_v54, inf }
 0x1e6   :  { %592 = vmax.xlane.f32.xlu1 %v567_v39  ;;  %590 = vmax.xlane.f32.xlu0 %v566_v49  ;;  %v572_v26 = vsel %vm508_vm0, %v399_v63, -inf  ;;  %vm528_vm11 = vmand %vm512_vm7, %vm491_vm1 }
 0x1e7   :  { %vm513_vm12 = vmxor %vm473_vm14, %vm1494_vm3  ;;  %v657_v1 = vsel %vm528_vm11, %v1902_v24, inf }
 0x1e8   :  { %vm530_vm0 = vmand %vm514_vm13, %vm491_vm1 }
 0x1e9   :  { %vm516_vm2 = vmxor %vm476_vm8, %vm1494_vm3  ;;  %v659_v14 = vsel %vm530_vm0, %v1927_v20, inf }
 0x1ea   :  { %596 = vmax.xlane.f32.xlu1 %v569_v59  ;;  %594 = vmax.xlane.f32.xlu0 %v568_v53  ;;  %vm529_vm7 = vmand %vm513_vm12, %vm491_vm1 }
 0x1eb   :  { %vm515_vm14 = vmxor %vm475_vm5, %vm1494_vm3  ;;  %v658_v47 = vsel %vm529_vm7, %v1876_v40, inf }
 0x1ec   :  { %vm532_vm11 = vmand %vm516_vm2, %vm491_vm1  ;;  %vm2247_vm2 = vcmp.eq.s32.totalorder %v1975_v44, %v1704_v0 }
 0x1ed   :  { %vm518_vm8 = vmxor %vm478_vm15, %vm1494_vm3  ;;  %v661_v33 = vsel %vm532_vm11, %v1955_v37, inf  ;;  %vm2245_vm15 = vcmp.eq.s32.totalorder %v1934_v32, %v1704_v0  ;;  %vm2248_vm11 = vcmp.eq.s32.totalorder %v1947_v36, %v1704_v0  ;;  %v544_v37 = vld [vmem:[#allocation2 + $0x10] sm:$0xff] }
 0x1ee   :  { %600 = vmax.xlane.f32.xlu1 %v571_v25  ;;  %598 = vmax.xlane.f32.xlu0 %v570_v23  ;;  %vm531_vm4 = vmand %vm515_vm14, %vm491_vm1 }
 0x1ef   :  { %vm517_vm5 = vmxor %vm477_vm9, %vm1494_vm3  ;;  %v660_v54 = vsel %vm531_vm4, %v1917_v29, inf  ;;  %vm2246_vm9 = vcmp.eq.s32.totalorder %v1908_v17, %v1704_v0 }
 0x1f0   :  { %vm534_vm10 = vmand %vm518_vm8, %vm491_vm1 }
 0x1f1   :  { %vm520_vm6 = vmxor %vm2245_vm15, %vm1494_vm3  ;;  %v663_v2 = vsel %vm534_vm10, %v1985_v61, inf  ;;  %v546_v61 = vld [vmem:[#allocation2 + $0x20] sm:$0xff] }
 0x1f2   :  { %604 = vmax.xlane.f32.xlu1 %v573_v58  ;;  %602 = vmax.xlane.f32.xlu0 %v572_v26  ;;  %vm533_vm13 = vmand %vm517_vm5, %vm491_vm1  ;;  %vm2249_vm5 = vcmp.eq.s32.totalorder %v2020_v52, %v1704_v0  ;;  %v552_v58 = vld [vmem:[#allocation2 + $0x50] sm:$0xff] }
 0x1f3   :  { %vm519_vm12 = vmxor %vm2246_vm9, %vm1494_vm3  ;;  %v662_v9 = vsel %vm533_vm13, %v1945_v35, inf }
 0x1f4   :  { %vm536_vm0 = vmand %vm520_vm6, %vm491_vm1  ;;  %vm2250_vm6 = vcmp.eq.s32.totalorder %v1991_v51, %v1704_v0 }
 0x1f5   :  { %vm522_vm7 = vmxor %vm2247_vm2, %vm1494_vm3  ;;  %v665_v40 = vsel %vm536_vm0, %v2013_v7, inf  ;;  %vm2251_vm0 = vcmp.eq.s32.totalorder %v2033_v8, %v1704_v0  ;;  %v549_v7 = vld [vmem:[#allocation2 + $0x38] sm:$0xff] }
 0x1f6   :  { %675 = vmin.xlane.f32.xlu1 %v657_v1  ;;  %673 = vmin.xlane.f32.xlu0 %v656_v31  ;;  %vm535_vm14 = vmand %vm519_vm12, %vm491_vm1 }
 0x1f7   :  { %vm521_vm8 = vmxor %vm2248_vm11, %vm1494_vm3  ;;  %v664_v11 = vsel %vm535_vm14, %v1973_v48, inf }
 0x1f8   :  { %vm538_vm4 = vmand %vm522_vm7, %vm491_vm1 }
 0x1f9   :  { %vm524_vm10 = vmxor %vm2249_vm5, %vm1494_vm3  ;;  %v667_v24 = vsel %vm538_vm4, %v2043_v19, inf  ;;  %v550_v19 = vld [vmem:[#allocation2 + $0x40] sm:$0xff] }
 0x1fa   :  { %679 = vmin.xlane.f32.xlu1 %v659_v14  ;;  %677 = vmin.xlane.f32.xlu0 %v658_v47  ;;  %vm537_vm15 = vmand %vm521_vm8, %vm491_vm1  ;;  %v555_v47 = vld [vmem:[#allocation2 + $0x68] sm:$0xff] }
 0x1fb   :  { %vm523_vm13 = vmxor %vm2250_vm6, %vm1494_vm3  ;;  %v666_v17 = vsel %vm537_vm15, %v2003_v55, inf }
 0x1fc   :  { %vm540_vm9 = vmand %vm524_vm10, %vm491_vm1 }
 0x1fd   :  { %vm539_vm12 = vmand %vm523_vm13, %vm491_vm1  ;;  %v669_v27 = vsel %vm540_vm9, %v399_v63, inf  ;;  %v553_v63 = vld [vmem:[#allocation2 + $0x58] sm:$0xff] }
 0x1fe   :  { %683 = vmin.xlane.f32.xlu1 %v661_v33  ;;  %681 = vmin.xlane.f32.xlu0 %v660_v54  ;;  %vm525_vm2 = vmxor %vm2251_vm0, %vm1494_vm3  ;;  %v668_v28 = vsel %vm539_vm12, %v2031_v4, inf  ;;  %vm2252_vm3 = vcmask 7168   ;;  %v554_v33 = vld [vmem:[#allocation2 + $0x60] sm:$0xff] }
 0x1ff   :  { %vm541_vm7 = vmand %vm525_vm2, %vm491_vm1 }
 0x200   :  { %v670_v29 = vsel %vm541_vm7, %v2056_v42, inf  ;;  %vm2253_vm1 = vmmov %vm2252_vm3 }
 0x201   :  { %vm2254_vm14 = vmmov %vm2253_vm1 }
 0x202   :  { %687 = vmin.xlane.f32.xlu1 %v663_v2  ;;  %685 = vmin.xlane.f32.xlu0 %v662_v9  ;;  %vm2255_vm11 = vmmov %vm2253_vm1 }
 0x203   :  { %vm2256_vm8 = vmmov %vm2253_vm1 }
 0x204   :  { %vm2257_vm4 = vmmov %vm2253_vm1 }
 0x205   :  { %vm2258_vm5 = vmmov %vm2253_vm1 }
 0x206   :  { %691 = vmin.xlane.f32.xlu1 %v665_v40  ;;  %689 = vmin.xlane.f32.xlu0 %v664_v11  ;;  %vm2259_vm10 = vmmov %vm2253_vm1  ;;  %v557_v11 = vld [vmem:[#allocation2 + $0x78] sm:$0xff] }
 0x207   :  { %vm2260_vm15 = vmmov %vm2253_vm1 }
 0x208   :  { %vm2261_vm6 = vmmov %vm2253_vm1 }
 0x209   :  { %vm2262_vm13 = vmmov %vm2253_vm1 }
 0x20a   :  { %695 = vmin.xlane.f32.xlu1 %v667_v24  ;;  %693 = vmin.xlane.f32.xlu0 %v666_v17  ;;  %v556_v24 = vld [vmem:[#allocation2 + $0x70] sm:$0xff]  ;;  %vm2263_vm9 = vmmov %vm2253_vm1 }
 0x20b   :  { %vm2264_vm12 = vmmov %vm2253_vm1 }
 0x20c   :  { %vm2265_vm0 = vmmov %vm2253_vm1 }
 0x20d   :  { %vm2266_vm2 = vmmov %vm2265_vm0 }
 0x20e   :  { %699 = vmin.xlane.f32.xlu1 %v669_v27  ;;  %697 = vmin.xlane.f32.xlu0 %v668_v28  ;;  %vm2267_vm7 = vmmov %vm2265_vm0 }
 0x212   :  { %701 = vmin.xlane.f32.xlu0 %v670_v29 }
 0x25f   :  { %v1273_v41 = vpop.xlane.xlu1 %1272  ;;  %v1271_v20 = vpop.xlane.xlu0 %1270 }
 0x260   :  { %v1275_v56 = vcvt.f32.s32 %v1273_v41  ;;  %v1274_v22 = vcvt.f32.s32 %v1271_v20  ;;  %v641_v41 = vld [vmem:[#allocation3 + $0x10] sm:$0xff]  ;;  %v640_v20 = vld [vmem:[#allocation3 + $0x8] sm:$0xff] }
 0x262   :  { %v1276_v32 = vshll.u32 %v1275_v56, 16 }
 0x263   :  { %v577_v34 = vpop.xlane.xlu1 %576  ;;  %v1174_v0 = vpop.xlane.xlu0 %1173 }
 0x264   :  { %v1277_v43 = vadd.s32 %v1276_v32, %v1274_v22  ;;  %v607_v35 = vmax.f32 %v543_v30, %v577_v34  ;;  %v1175_v36 = vrot.slane %v1174_v0, 4  ;;  %v643_v34 = vld [vmem:[#allocation3 + $0x20] sm:$0xff] }
 0x266   :  { %v1278_v60 = vrot.slane %v1277_v43, 4  ;;  %624 = vst.msk [vmem:[#allocation2 + $0x8] sm:$0xff] %vm2252_vm3, %v607_v35  ;;  %v1176_v62 = vadd.f32 %v1175_v36, %v1174_v0  ;;  %v642_v0 = vld [vmem:[#allocation3 + $0x18] sm:$0xff]  ;;  %vm2268_vm3 = vmmov %vm2265_vm0 }
 0x267   :  { %v581_v38 = vpop.xlane.xlu1 %580  ;;  %v579_v6 = vpop.xlane.xlu0 %578 }
 0x268   :  { %v1279_v45 = vadd.s32 %v1278_v60, %v1277_v43  ;;  %v1177_v46 = vrot.slane %v1176_v62, 2  ;;  %v609_v48 = vmax.f32 %v545_v3, %v581_v38  ;;  %v608_v44 = vmax.f32 %v544_v37, %v579_v6  ;;  %v645_v37 = vld [vmem:[#allocation3 + $0x30] sm:$0xff]  ;;  %v644_v60 = vld [vmem:[#allocation3 + $0x28] sm:$0xff] }
 0x26a   :  { %626 = vst.msk [vmem:[#allocation2 + $0x18] sm:$0xff] %vm2253_vm1, %v609_v48  ;;  %v1178_v50 = vadd.f32 %v1177_v46, %v1176_v62  ;;  %v1280_v51 = vrot.slane %v1279_v45, 2  ;;  %vm2269_vm1 = vmmov %vm2265_vm0  ;;  %v647_v46 = vld [vmem:[#allocation3 + $0x40] sm:$0xff]  ;;  %v646_v48 = vld [vmem:[#allocation3 + $0x38] sm:$0xff] }
 0x26b   :  { %625 = vst.msk [vmem:[#allocation2 + $0x10] sm:$0xff] %vm2254_vm14, %v608_v44  ;;  %v585_v5 = vpop.xlane.xlu1 %584  ;;  %v583_v12 = vpop.xlane.xlu0 %582  ;;  %vm2270_vm14 = vmmov %vm2265_vm0 }
 0x26c   :  { %v611_v39 = vmax.f32 %v547_v10, %v585_v5  ;;  %v610_v49 = vmax.f32 %v546_v61, %v583_v12  ;;  %v1179_v55 = vrot.slane %v1178_v50, 1  ;;  %v1281_v16 = vadd.s32 %v1280_v51, %v1279_v45  ;;  %v649_v51 = vld [vmem:[#allocation3 + $0x50] sm:$0xff]  ;;  %v648_v5 = vld [vmem:[#allocation3 + $0x48] sm:$0xff] }
 0x26e   :  { %628 = vst.msk [vmem:[#allocation2 + $0x28] sm:$0xff] %vm2255_vm11, %v611_v39  ;;  %v1180_v13 = vadd.f32 %v1179_v55, %v1178_v50  ;;  %v1282_v52 = vrot.slane %v1281_v16, 1  ;;  %vm2271_vm11 = vmmov %vm2265_vm0 }
 0x26f   :  { %627 = vst.msk [vmem:[#allocation2 + $0x20] sm:$0xff] %vm2256_vm8, %v610_v49  ;;  %v589_v18 = vpop.xlane.xlu1 %588  ;;  %v587_v59 = vpop.xlane.xlu0 %586  ;;  %vm2272_vm8 = vmmov %vm2265_vm0 }
 0x270   :  { %v613_v53 = vmax.f32 %v549_v7, %v589_v18  ;;  %v612_v4 = vmax.f32 %v548_v57, %v587_v59  ;;  %1451 = vpush %v1180_v13  ;;  %v1283_v8 = vadd.s32 %v1282_v52, %v1281_v16  ;;  %v651_v16 = vld [vmem:[#allocation3 + $0x60] sm:$0xff]  ;;  %v650_v7 = vld [vmem:[#allocation3 + $0x58] sm:$0xff]  ;;  %v653_v59 = vld [vmem:[#allocation3 + $0x70] sm:$0xff] }
 0x272   :  { %630 = vst.msk [vmem:[#allocation2 + $0x38] sm:$0xff] %vm2257_vm4, %v613_v53  ;;  %vm2273_vm4 = vmmov %vm2265_vm0  ;;  %v652_v53 = vld [vmem:[#allocation3 + $0x68] sm:$0xff] }
 0x273   :  { %629 = vst.msk [vmem:[#allocation2 + $0x30] sm:$0xff] %vm2258_vm5, %v612_v4  ;;  %v593_v15 = vpop.xlane.xlu1 %592  ;;  %v591_v25 = vpop.xlane.xlu0 %590  ;;  %vm2274_vm5 = vmmov %vm2265_vm0 }
 0x274   :  { %1453 = vpush %v1283_v8  ;;  %v615_v23 = vmax.f32 %v551_v21, %v593_v15  ;;  %v614_v42 = vmax.f32 %v550_v19, %v591_v25  ;;  %v654_v15 = vld [vmem:[#allocation3 + $0x78] sm:$0xff] }
 0x276   :  { %632 = vst.msk [vmem:[#allocation2 + $0x48] sm:$0xff] %vm2259_vm10, %v615_v23  ;;  %vm2275_vm10 = vmmov %vm2265_vm0 }
 0x277   :  { %631 = vst.msk [vmem:[#allocation2 + $0x40] sm:$0xff] %vm2260_vm15, %v614_v42  ;;  %v597_v26 = vpop.xlane.xlu1 %596  ;;  %v595_v1 = vpop.xlane.xlu0 %594  ;;  %vm2276_vm15 = vmmov %vm2265_vm0 }
 0x278   :  { %v617_v31 = vmax.f32 %v553_v63, %v597_v26  ;;  %v616_v14 = vmax.f32 %v552_v58, %v595_v1 }
 0x27a   :  { %634 = vst.msk [vmem:[#allocation2 + $0x58] sm:$0xff] %vm2261_vm6, %v617_v31  ;;  %vm2277_vm6 = vmmov %vm2265_vm0 }
 0x27b   :  { %633 = vst.msk [vmem:[#allocation2 + $0x50] sm:$0xff] %vm2262_vm13, %v616_v14  ;;  %v601_v54 = vpop.xlane.xlu1 %600  ;;  %v599_v2 = vpop.xlane.xlu0 %598  ;;  %vm2278_vm13 = vmmov %vm2265_vm0 }
 0x27c   :  { %v619_v9 = vmax.f32 %v555_v47, %v601_v54  ;;  %v618_v40 = vmax.f32 %v554_v33, %v599_v2 }
 0x27e   :  { %636 = vst.msk [vmem:[#allocation2 + $0x68] sm:$0xff] %vm2263_vm9, %v619_v9  ;;  %vm2279_vm9 = vmmov %vm2265_vm0 }
 0x27f   :  { %635 = vst.msk [vmem:[#allocation2 + $0x60] sm:$0xff] %vm2264_vm12, %v618_v40  ;;  %v605_v17 = vpop.xlane.xlu1 %604  ;;  %v603_v27 = vpop.xlane.xlu0 %602  ;;  %vm2280_vm12 = vmmov %vm2265_vm0 }
 0x280   :  { %v621_v28 = vmax.f32 %v557_v11, %v605_v17  ;;  %v620_v29 = vmax.f32 %v556_v24, %v603_v27 }
 0x282   :  { %638 = vst.msk [vmem:[#allocation2 + $0x78] sm:$0xff] %vm2265_vm0, %v621_v28 }
 0x283   :  { %637 = vst.msk [vmem:[#allocation2 + $0x70] sm:$0xff] %vm2266_vm2, %v620_v29  ;;  %v676_v56 = vpop.xlane.xlu1 %675  ;;  %v674_v30 = vpop.xlane.xlu0 %673 }
 0x284   :  { %v705_v32 = vmin.f32 %v641_v41, %v676_v56  ;;  %v704_v22 = vmin.f32 %v640_v20, %v674_v30 }
 0x286   :  { %721 = vst.msk [vmem:[#allocation3 + $0x10] sm:$0xff] %vm2267_vm7, %v705_v32 }
 0x287   :  { %720 = vst.msk [vmem:[#allocation3 + $0x8] sm:$0xff] %vm2268_vm3, %v704_v22  ;;  %v680_v43 = vpop.xlane.xlu1 %679  ;;  %v678_v35 = vpop.xlane.xlu0 %677 }
 0x288   :  { %v707_v36 = vmin.f32 %v643_v34, %v680_v43  ;;  %v706_v3 = vmin.f32 %v642_v0, %v678_v35 }
 0x28a   :  { %723 = vst.msk [vmem:[#allocation3 + $0x20] sm:$0xff] %vm2269_vm1, %v707_v36 }
 0x28b   :  { %722 = vst.msk [vmem:[#allocation3 + $0x18] sm:$0xff] %vm2270_vm14, %v706_v3  ;;  %v684_v62 = vpop.xlane.xlu1 %683  ;;  %v682_v38 = vpop.xlane.xlu0 %681 }
 0x28c   :  { %v709_v6 = vmin.f32 %v645_v37, %v684_v62  ;;  %v708_v45 = vmin.f32 %v644_v60, %v682_v38 }
 0x28e   :  { %725 = vst.msk [vmem:[#allocation3 + $0x30] sm:$0xff] %vm2271_vm11, %v709_v6 }
 0x28f   :  { %724 = vst.msk [vmem:[#allocation3 + $0x28] sm:$0xff] %vm2272_vm8, %v708_v45  ;;  %v688_v44 = vpop.xlane.xlu1 %687  ;;  %v686_v10 = vpop.xlane.xlu0 %685 }
 0x290   :  { %v711_v61 = vmin.f32 %v647_v46, %v688_v44  ;;  %v710_v50 = vmin.f32 %v646_v48, %v686_v10 }
 0x292   :  { %727 = vst.msk [vmem:[#allocation3 + $0x40] sm:$0xff] %vm2273_vm4, %v711_v61 }
 0x293   :  { %726 = vst.msk [vmem:[#allocation3 + $0x38] sm:$0xff] %vm2274_vm5, %v710_v50  ;;  %v692_v12 = vpop.xlane.xlu1 %691  ;;  %v690_v39 = vpop.xlane.xlu0 %689 }
 0x294   :  { %v713_v49 = vmin.f32 %v649_v51, %v692_v12  ;;  %v712_v55 = vmin.f32 %v648_v5, %v690_v39 }
 0x296   :  { %729 = vst.msk [vmem:[#allocation3 + $0x50] sm:$0xff] %vm2275_vm10, %v713_v49 }
 0x297   :  { %728 = vst.msk [vmem:[#allocation3 + $0x48] sm:$0xff] %vm2276_vm15, %v712_v55  ;;  %v696_v57 = vpop.xlane.xlu1 %695  ;;  %v694_v13 = vpop.xlane.xlu0 %693 }
 0x298   :  { %v715_v52 = vmin.f32 %v651_v16, %v696_v57  ;;  %v714_v18 = vmin.f32 %v650_v7, %v694_v13 }
 0x29a   :  { %731 = vst.msk [vmem:[#allocation3 + $0x60] sm:$0xff] %vm2277_vm6, %v715_v52 }
 0x29b   :  { %730 = vst.msk [vmem:[#allocation3 + $0x58] sm:$0xff] %vm2278_vm13, %v714_v18  ;;  %v700_v4 = vpop.xlane.xlu1 %699  ;;  %v698_v8 = vpop.xlane.xlu0 %697 }
 0x29c   :  { %v717_v21 = vmin.f32 %v653_v59, %v700_v4  ;;  %v716_v19 = vmin.f32 %v652_v53, %v698_v8 }
 0x29e   :  { %733 = vst.msk [vmem:[#allocation3 + $0x70] sm:$0xff] %vm2279_vm9, %v717_v21 }
 0x29f   :  { %732 = vst.msk [vmem:[#allocation3 + $0x68] sm:$0xff] %vm2280_vm12, %v716_v19  ;;  %v702_v25 = vpop.xlane.xlu0 %701 }
 0x2a0   :  { %v718_v23 = vmin.f32 %v654_v15, %v702_v25 }
 0x2a1   :  { %s1452_s4 = spop %1451 }
 0x2a2   :  { %734 = vst.msk [vmem:[#allocation3 + $0x78] sm:$0xff] %vm2265_vm0, %v718_v23  ;;  %s1182_s11 = smul.f32 0.125, %s1452_s4 }
 0x2a4   :  { %1185 = sst [smem:[#allocation4]] %s1182_s11 }
 0x2a5   :  { %s1454_s12 = spop %1453 }
 0x2a6   :  { %1287 = sst [smem:[#allocation6]] %s1454_s12 }
 0x2a7   :  { %1478 = shalt.err (!%p1475_p2)
}
 0x2a8   :  { %s1497_s1 = smov [#allocation4]   ;;  %s1479_s21 = scalar_lea.hbm %s2234_s7, 16 }
 0x2a9   :  { %1295 = dma.smem_to_hbm %s1497_s1, 16, %s2233_s6, [#allocation5]  }
 0x2aa   :  { %p1480_p3 = scmp.ne.s32.totalorder %s2234_s7, %s1479_s21  ;;  %p1483_p4 = scmp.lt.u32.totalorder %s1479_s21, %s2234_s7 }
 0x2ac   :  { %p1485_p5 = pnand %p1483_p4, %p1480_p3 }
 0x2ae   :  { %1488 = shalt.err (!%p1485_p5)
}
 0x2af   :  { %s1498_s26 = smov [#allocation6]  }
 0x2b0   :  { %1303 = dma.smem_to_hbm %s1498_s26, 16, %s2234_s7, [#allocation7]  }
 0x2b1   :  { %1489 = dma.done.wait [#allocation5], 16  }
 0x2b2   :  { %1490 = vsyncadd [#allocation5], 4294967280 }
 0x2b3   :  { %1491 = dma.done.wait [#allocation7], 16  }
 0x2b4   :  { %1492 = vsyncadd [#allocation7], 4294967280 }
 0x2b5   :  { %1310 = sfence }
 0x2b6   :  { %1311 = vsyncpa [#allocation5], 1 }
 0x2b7   :  { %1312 = vsyncpa [#allocation7], 1 }

</bundles_post_ra>
